<compile_context>
chip_gen: v7x
topology: tpu7x:2x2x1
jax: 0.10.0
libtpu: 0.0.40
codegen_flags: <defaults>
</compile_context>

<pallas_src>
import jax
import jax.numpy as jnp
from jax.experimental import pallas as pl
from jax.experimental.pallas import tpu as pltpu


LANES = 128


def _round_up(x: int, m: int) -> int:
    return (x + m - 1) // m * m


# ----------------------------------------------------------------------------
# Pallas kernel: y_tile = cast_bf16(x_tile) @ W_blockdiag + b   (f32 accumulate)
# ----------------------------------------------------------------------------
def _linear_kernel(x_ref, w_ref, b_ref, o_ref):
    # x_ref: (TMf, 128) f32 — cast to bf16 here (fuses the cast into the
    #        kernel instead of a separate wrapper pass over all of x).
    # w_ref: (128, 128) bf16 block-diagonal weight, VMEM-resident across grid.
    # b_ref: (1, 128)  f32 tiled bias, resident.
    # o_ref: (TMf, 128) bf16 — f32 MXU accumulate, bias add in f32, one cast
    #        at the (unmasked, lane-dense) store.
    x_bf = x_ref[...].astype(jnp.bfloat16)
    acc = jnp.dot(x_bf, w_ref[...], preferred_element_type=jnp.float32)
    o_ref[...] = (acc + b_ref[...]).astype(o_ref.dtype)


def _pick_tile(mf: int) -> int:
    # Folded-row tile size.  Tiny inputs: one full block (block dim == array
    # dim satisfies the (8,128) rule).  Larger inputs: >= 2 grid steps so the
    # "parallel" M axis can split across v7x's two TensorCores, tile a
    # multiple of 8 sublanes, capped at 1024 folded rows.
    if mf <= 8:
        return mf
    return min(1024, _round_up(pl.cdiv(mf, 2), 8))


def pallas_linear_folded(x_fold, w_fold, b_fold, tmf, out_dtype):
    """x_fold: [Mf, 128] f32, w_fold: [128, 128] bf16, b_fold: [1, 128] f32
    -> [Mf, 128] out_dtype.  cdiv grid; no padding of Mf to a tile multiple
    (a partial last block, if any, is handled by Pallas boundary masking)."""
    mf, kf = x_fold.shape
    _, nf = w_fold.shape
    return pl.pallas_call(
        _linear_kernel,
        out_shape=jax.ShapeDtypeStruct((mf, nf), out_dtype),
        grid=(pl.cdiv(mf, tmf),),
        in_specs=[
            pl.BlockSpec((tmf, kf), lambda i: (i, 0)),   # x: tiled along folded-M
            pl.BlockSpec((kf, nf), lambda i: (0, 0)),    # W: resident (no re-DMA)
            pl.BlockSpec((1, nf), lambda i: (0, 0)),     # b: resident
        ],
        out_specs=pl.BlockSpec((tmf, nf), lambda i: (i, 0)),
        compiler_params=pltpu.CompilerParams(
            dimension_semantics=("parallel",),           # v7x: split M over 2 TCs
        ),
    )(x_fold, w_fold, b_fold)


# ----------------------------------------------------------------------------
# Representative wrapped module (Linear) whose forward uses the Pallas kernel.
# ----------------------------------------------------------------------------
class PallasLinearModule:
    """Linear(hidden -> hidden) with a row-folded, lane-dense layout.

    hidden=32 is folded 4x into the 128-lane dim: x [M,32] -> [M/4,128]
    (free contiguous reshape); W becomes a 128x128 block-diagonal with 4
    copies of the 32x32 weight; bias is tiled 4x along lanes.  Output dtype
    is bf16 (f32 accumulate inside the kernel, cast only at the store).
    """

    def __init__(self, in_features, out_features, key, out_dtype=jnp.bfloat16):
        assert LANES % in_features == 0, "fold factor must be integral"
        assert in_features == out_features, "block-diag fold assumes square weight"
        fold = LANES // in_features
        kw, kb = jax.random.split(key)

        self.in_features = in_features
        self.out_features = out_features
        self.fold = fold
        self.out_dtype = out_dtype
        # Deterministic synthetic init (no checkpoint load).
        self.weight = jax.random.normal(
            kw, (in_features, out_features), jnp.float32) * 0.02
        self.bias = jax.random.normal(kb, (1, out_features), jnp.float32) * 0.02

        # One-time block-diagonal bf16 weight + lane-tiled f32 bias.
        w_bf = self.weight.astype(jnp.bfloat16)
        w_fold = jnp.zeros((LANES, LANES), jnp.bfloat16)
        for j in range(fold):
            w_fold = w_fold.at[
                j * in_features:(j + 1) * in_features,
                j * out_features:(j + 1) * out_features].set(w_bf)
        self._w_fold = w_fold
        self._b_fold = jnp.tile(self.bias, (1, fold))    # (1, 128) f32

    def __call__(self, x):
        # x: [batch, seq, hidden] f32 -> [batch, seq, hidden] bf16
        b, s, h = x.shape
        assert h == self.in_features
        m = b * s
        fold = self.fold

        x2d = x.reshape(m, h)
        m_pad = _round_up(m, fold)
        if m_pad != m:
            # Rare: pad only to the fold factor (<= 3 rows), never to the tile
            # size.  Padded rows produce bias-valued outputs which are sliced
            # off below, so they never reach the caller.
            x2d = jnp.pad(x2d, ((0, m_pad - m), (0, 0)))
        mf = m_pad // fold
        x_fold = x2d.reshape(mf, fold * h)   # free contiguous reshape -> [Mf, 128]

        tmf = _pick_tile(mf)
        y_fold = pallas_linear_folded(
            x_fold, self._w_fold, self._b_fold, tmf, self.out_dtype)

        y2d = y_fold.reshape(m_pad, self.out_features)[:m]
        return y2d.reshape(b, s, self.out_features)


# ----------------------------------------------------------------------------
# NullDDP: exact semantics of the PyTorch module — forward delegates verbatim.
# ----------------------------------------------------------------------------
class NullDDP:
    def __init__(self, module, *args, **kwargs):
        self.module = module
        self.require_backward_grad_sync = False

    def __call__(self, *args, **kwargs):
        # Identical to PyTorch: return self.module(*args, **kwargs)
        return self.module(*args, **kwargs)


def _ref(x, module):
    """Reference matching kernel numerics (bf16 operands, f32 accumulate,
    f32 bias add, cast to the kernel's output dtype)."""
    b, s, h = x.shape
    xb = x.reshape(-1, h).astype(jnp.bfloat16)
    wb = module.weight.astype(jnp.bfloat16)
    y = jnp.dot(xb, wb, preferred_element_type=jnp.float32) + module.bias
    return y.astype(module.out_dtype).reshape(b, s, module.out_features)


if __name__ == "__main__":
    key = jax.random.PRNGKey(0)
    k_x, k_x2, k_mod = jax.random.split(key, 3)

    batch, seq, hidden = 2, 8, 32
    x = jax.random.normal(k_x, (batch, seq, hidden), jnp.float32)

    inner = PallasLinearModule(hidden, hidden, k_mod)
    model = NullDDP(inner)

    # --- small demo shape (matches the original module usage) ---------------
    out = jax.block_until_ready(model(x))
    direct = jax.block_until_ready(inner(x))
    ref = _ref(x, inner)
    ref_f32 = (x.reshape(-1, hidden) @ inner.weight + inner.bias).reshape(
        batch, seq, hidden)

    assert out.shape == (batch, seq, hidden)
    assert out.dtype == inner.out_dtype
    # NullDDP(module)(x) must equal module(x) exactly (pure delegation).
    assert jnp.array_equal(out, direct)
    # Matches the bf16-operand / f32-accumulate reference.
    assert jnp.allclose(out.astype(jnp.float32), ref.astype(jnp.float32),
                        atol=2e-2, rtol=2e-2)
    # And the pure-f32 reference within bf16 rounding tolerance.
    assert jnp.allclose(out.astype(jnp.float32), ref_f32, atol=5e-2, rtol=5e-2)

    # --- larger M to exercise the tiled grid (Mf=256, TMf=128, grid=(2,)) ---
    batch2, seq2 = 8, 128  # M = 1024
    x_big = jax.random.normal(k_x2, (batch2, seq2, hidden), jnp.float32)
    out_big = jax.block_until_ready(model(x_big))
    ref_big = _ref(x_big, inner)
    assert out_big.shape == (batch2, seq2, hidden)
    assert jnp.allclose(out_big.astype(jnp.float32),
                        ref_big.astype(jnp.float32), atol=2e-2, rtol=2e-2)

    print("KERNEL_OK")
</pallas_src>

<mosaic_0001>
module attributes {stable_mosaic.version = 11 : i64} {
  func.func @_linear_kernel(%arg0: i32, %arg1: memref<4x128xf32, #tpu.memory_space<vmem>>, %arg2: memref<128x128xbf16, #tpu.memory_space<vmem>>, %arg3: memref<1x128xf32, #tpu.memory_space<vmem>>, %arg4: memref<4x128xbf16, #tpu.memory_space<vmem>>) attributes {dimension_semantics = [#tpu.dimension_semantics<parallel>], iteration_bounds = array<i64: 1>, scalar_prefetch = 0 : i64, scratch_operands = 0 : i64, tpu.core_type = #tpu.core_type<tc>, window_params = [{transform_indices = @transform_0, window_bounds = array<i64: 4, 128>}, {pipeline_mode = #tpu.pipeline_mode<synchronous>, transform_indices = @transform_1, window_bounds = array<i64: 128, 128>}, {pipeline_mode = #tpu.pipeline_mode<synchronous>, transform_indices = @transform_2, window_bounds = array<i64: 1, 128>}, {transform_indices = @transform_3, window_bounds = array<i64: 4, 128>}]} {
    %c0 = arith.constant 0 : index
    %c0_0 = arith.constant 0 : index
    %0 = vector.load %arg1[%c0, %c0_0] : memref<4x128xf32, #tpu.memory_space<vmem>>, vector<4x128xf32>
    %1 = arith.truncf %0 : vector<4x128xf32> to vector<4x128xbf16>
    %c0_1 = arith.constant 0 : index
    %c0_2 = arith.constant 0 : index
    %2 = vector.load %arg2[%c0_1, %c0_2] : memref<128x128xbf16, #tpu.memory_space<vmem>>, vector<128x128xbf16>
    %cst = arith.constant dense<0.000000e+00> : vector<4x128xf32>
    %3 = tpu.matmul %1, %2, %cst {dimension_numbers = #tpu.dot_dimension_numbers<[1], [0], [0], [1], [0, 0, 1, 1], [], []>} : vector<4x128xbf16>, vector<128x128xbf16>, vector<4x128xf32> -> vector<4x128xf32>
    %c0_3 = arith.constant 0 : index
    %c0_4 = arith.constant 0 : index
    %4 = vector.load %arg3[%c0_3, %c0_4] : memref<1x128xf32, #tpu.memory_space<vmem>>, vector<1x128xf32>
    %5 = vector.broadcast %4 : vector<1x128xf32> to vector<4x128xf32>
    %6 = arith.addf %3, %5 : vector<4x128xf32>
    %7 = arith.truncf %6 : vector<4x128xf32> to vector<4x128xbf16>
    %c0_5 = arith.constant 0 : index
    %c0_6 = arith.constant 0 : index
    %8 = vector.load %arg4[%c0_5, %c0_6] : memref<4x128xbf16, #tpu.memory_space<vmem>>, vector<4x128xbf16>
    tpu.vector_store %arg4[%c0_5, %c0_6], %7 {strides = array<i32>} : memref<4x128xbf16, #tpu.memory_space<vmem>>, vector<4x128xbf16>,
    return
  }
  func.func @transform_0(%arg0: i32) -> (i32, i32) {
    %c0_i32 = arith.constant 0 : i32
    %c0_i32_0 = arith.constant 0 : i32
    return %arg0, %c0_i32 : i32, i32
  }
  func.func @transform_1(%arg0: i32) -> (i32, i32) {
    %c0_i32 = arith.constant 0 : i32
    %c0_i32_0 = arith.constant 0 : i32
    %c0_i32_1 = arith.constant 0 : i32
    return %c0_i32, %c0_i32_0 : i32, i32
  }
  func.func @transform_2(%arg0: i32) -> (i32, i32) {
    %c0_i32 = arith.constant 0 : i32
    %c0_i32_0 = arith.constant 0 : i32
    %c0_i32_1 = arith.constant 0 : i32
    return %c0_i32, %c0_i32_0 : i32, i32
  }
  func.func @transform_3(%arg0: i32) -> (i32, i32) {
    %c0_i32 = arith.constant 0 : i32
    %c0_i32_0 = arith.constant 0 : i32
    return %arg0, %c0_i32 : i32, i32
  }
}

</mosaic_0001>

<bundles_post_ra>
// kernel: tpu_custom_call.1
= control target key start
LH: loop header
LB: loop body
LE: loop exit
PB: predicated region body
PF: predicated region fallthrough
CT: control target
= control target key end

     0   :  { %8 = vsyncpa [#allocation3], 0  ;;  %s371_s0 = inlined_call_operand.hbm [shape: f32[4,128], index: 0, kind: input, shape index: {}]   ;;  %s372_s1 = inlined_call_operand.hbm [shape: bf16[128,128], index: 1, kind: input, shape index: {}]   ;;  %s373_s2 = inlined_call_operand.vmem [shape: f32[1,128], index: 2, kind: input, shape index: {}]   ;;  %s374_s3 = inlined_call_operand.hbm [shape: bf16[4,128], index: 3, kind: output, shape index: {}]  }
   0x1   :  { %9 = vsyncpa [#allocation6], 0 }
   0x2   :  { %10 = vsyncpa [#allocation4], 0  ;;  %s298_s12 = smov [#allocation2]   ;;  %s299_s14 = smov [#allocation5]  }
   0x3   :  { %s17_s13 = sshll.u32 %s298_s12, 4  ;;  %s26_s15 = sshll.u32 %s299_s14, 4  ;;  %s18_s13 = int_to_ptr.vmem [resolvable:$true] %s17_s13  ;;  %s325_s15 = int_to_ptr.vmem [resolvable:$true] %s26_s15 }
   0x4   :  { %s226_s18 = scalar_lea.hbm %s371_s0, 64 }
   0x5   :  { %p227_p0 = scmp.ne.s32.totalorder %s371_s0, %s226_s18  ;;  %p230_p1 = scmp.lt.u32.totalorder %s226_s18, %s371_s0 }
   0x7   :  { %p232_p2 = pnand %p230_p1, %p227_p0 }
   0x9   :  { %235 = shalt.err (!%p232_p2)
}
   0xa   :  { %s236_s23 = scalar_lea.vmem %s18_s13, 64  ;;  %p241_p4 = scmp.lt.s32.totalorder %s18_s13, %s18_s13 }
   0xb   :  { %p237_p3 = scmp.ne.s32.totalorder %s18_s13, %s236_s23  ;;  %p242_p5 = scmp.lt.s32.totalorder %s236_s23, %s236_s23 }
   0xd   :  { %p243_p6 = por %p242_p5, %p241_p4 }
   0xf   :  { %p244_p7 = pnand %p243_p6, %p237_p3 }
  0x11   :  { %247 = shalt.err (!%p244_p7)
}
  0x12   :  { %20 = dma.hbm_to_vmem [thread:$0]  %s371_s0, 64, %s18_s13, [#allocation3]  }
  0x13   :  { %s248_s28 = scalar_lea.hbm %s372_s1, 1024 }
  0x14   :  { %p249_p8 = scmp.ne.s32.totalorder %s372_s1, %s248_s28  ;;  %p252_p9 = scmp.lt.u32.totalorder %s248_s28, %s372_s1 }
  0x16   :  { %p254_p10 = pnand %p252_p9, %p249_p8 }
  0x18   :  { %257 = shalt.err (!%p254_p10)
}
  0x19   :  { %s258_s6 = scalar_lea.vmem %s325_s15, 1024  ;;  %p263_p12 = scmp.lt.s32.totalorder %s325_s15, %s325_s15 }
  0x1a   :  { %p259_p11 = scmp.ne.s32.totalorder %s325_s15, %s258_s6  ;;  %p264_p13 = scmp.lt.s32.totalorder %s258_s6, %s258_s6 }
  0x1c   :  { %p265_p0 = por %p264_p13, %p263_p12 }
  0x1e   :  { %p266_p1 = pnand %p265_p0, %p259_p11 }
  0x20   :  { %269 = shalt.err (!%p266_p1)
}
  0x21   :  { %s300_s0 = smov 64   ;;  %s301_s7 = smov 4  }
  0x22   :  { %32 = dma.hbm_to_vmem [thread:$0]  %s372_s1, 1024, %s325_s15, [#allocation6], %s300_s0, %s300_s0, %s301_s7  }
  0x23   :  { %292 = dma.done.wait [#allocation3], 64  }
  0x24   :  { %293 = vsyncadd [#allocation3], 4294967232 }
  0x25   :  { %294 = dma.done.wait [#allocation6], 1024  }
  0x26   :  { %295 = vsyncadd [#allocation6], 4294966272  ;;  %v302_v0 = vmov 0.0   ;;  %vm303_vm0 = vmmov 0   ;;  %v218_v1 = vld [vmem:[#allocation5] sm:$0xff]   ;;  %v219_v2 = vld [vmem:[#allocation5 + $0x8] sm:$0xff]  }
  0x27   :  { %191 = vmatprep.subr.bf16.mxu0 %v302_v0  ;;  %207 = vmatprep.mubr.msk.bf16.mxu0 %vm303_vm0, %v302_v0  ;;  %v220_v3 = vld [vmem:[#allocation5 + $0x10] sm:$0xff]   ;;  %v221_v4 = vld [vmem:[#allocation5 + $0x18] sm:$0xff]   ;;  %v222_v5 = vld [vmem:[#allocation5 + $0x20] sm:$0xff]   ;;  %s304_s11 = smov [#allocation7]  }
  0x28   :  { %192 = vmatpush3.bf16.msra.mxu0 %v218_v1  ;;  %v223_v6 = vld [vmem:[#allocation5 + $0x28] sm:$0xff]   ;;  %v224_v7 = vld [vmem:[#allocation5 + $0x30] sm:$0xff]   ;;  %v225_v8 = vld [vmem:[#allocation5 + $0x38] sm:$0xff]   ;;  %s163_s12 = sshll.u32 %s304_s11, 4  ;;  %s164_s12 = int_to_ptr.vmem [resolvable:$true] %s163_s12 }
  0x29   :  { %193 = vmatprep.subr.bf16.mxu0 %v302_v0  ;;  %v42_v9 = vld [vmem:[#allocation2] sm:$0xf]  ;;  %s270_s13 = scalar_lea.vmem %s164_s12, 32  ;;  %p275_p3 = scmp.lt.s32.totalorder %s164_s12, %s164_s12 }
  0x2a   :  { %v43_v10 = vpack.c.bf16 %v42_v9, %v42_v9  ;;  %v173_v11 = vld [vmem:[%s373_s2] ss:$0 sm:$0xff]  ;;  %p271_p2 = scmp.ne.s32.totalorder %s164_s12, %s270_s13  ;;  %p276_p4 = scmp.lt.s32.totalorder %s270_s13, %s270_s13 }
  0x2c   :  { %194 = vmatpush3.bf16.msra.mxu0 %v219_v2  ;;  %p277_p5 = por %p276_p4, %p275_p3 }
  0x2d   :  { %195 = vmatprep.subr.bf16.mxu0 %v302_v0 }
  0x2e   :  { %p278_p6 = pnand %p277_p5, %p271_p2 }
  0x30   :  { %196 = vmatpush3.bf16.msra.mxu0 %v220_v3 }
  0x31   :  { %197 = vmatprep.subr.bf16.mxu0 %v302_v0 }
  0x34   :  { %198 = vmatpush3.bf16.msra.mxu0 %v221_v4 }
  0x35   :  { %199 = vmatprep.subr.bf16.mxu0 %v302_v0 }
  0x38   :  { %200 = vmatpush3.bf16.msra.mxu0 %v222_v5 }
  0x39   :  { %201 = vmatprep.subr.bf16.mxu0 %v302_v0 }
  0x3c   :  { %202 = vmatpush3.bf16.msra.mxu0 %v223_v6 }
  0x3d   :  { %203 = vmatprep.subr.bf16.mxu0 %v302_v0 }
  0x40   :  { %204 = vmatpush3.bf16.msra.mxu0 %v224_v7 }
  0x41   :  { %205 = vmatprep.subr.bf16.mxu0 %v302_v0 }
  0x44   :  { %206 = vmatpush3.bf16.msra.mxu0 %v225_v8 }
  0x47   :  { %208 = vmatmul.mubr.bf16.vlgmr.msra.gmra.mrb[0].mxu0 %v43_v10 }
 0x11a   :  { %v149_v12 = vpop.f32.mrb[0].mxu0 }
 0x11b   :  { %v150_v13 = vadd.f32 %v173_v11, %v149_v12  ;;  %v209_v14 = vpop.f32.mrb[1].mxu0 }
 0x11c   :  { %v152_v15 = vpop.f32.mrb[2].mxu0 }
 0x11d   :  { %v155_v16 = vpack.c.bf16 %v150_v13, %v150_v13  ;;  %v210_v17 = vpop.f32.mrb[3].mxu0 }
 0x11f   :  { %156 = vst [vmem:[#allocation7] sm:$0x3] %v155_v16 }
 0x120   :  { %281 = shalt.err (!%p278_p6)
}
 0x121   :  { %s282_s2 = scalar_lea.hbm %s374_s3, 32 }
 0x122   :  { %p283_p7 = scmp.ne.s32.totalorder %s374_s3, %s282_s2  ;;  %p286_p8 = scmp.lt.u32.totalorder %s282_s2, %s374_s3 }
 0x124   :  { %p288_p9 = pnand %p286_p8, %p283_p7 }
 0x126   :  { %291 = shalt.err (!%p288_p9)
}
 0x127   :  { %166 = dma.vmem_to_hbm [thread:$0]  %s164_s12, 32, %s374_s3, [#allocation4]  }
 0x128   :  { %296 = dma.done.wait [#allocation4], 32  }
 0x129   :  { %297 = vsyncadd [#allocation4], 4294967264 }
 0x12a   :  { %170 = vsyncpa [#allocation3], 1 }
 0x12b   :  { %171 = vsyncpa [#allocation6], 1 }
 0x12c   :  { %172 = vsyncpa [#allocation4], 1 }

</bundles_post_ra>
